<compile_context>
chip_gen: v7x
topology: tpu7x:2x2x1
jax: 0.10.0
libtpu: 0.0.40
codegen_flags: <defaults>
</compile_context>

<pallas_src>
import functools

import jax
import jax.numpy as jnp
from jax.experimental import pallas as pl
from jax.experimental.pallas import tpu as pltpu


# ----------------------------------------------------------------------------- helpers


def _depthwise3x3(x, w, b, row, col, H, W):
    """Depthwise 3x3 conv (stride 1, zero pad 1) on a lane-flattened spatial axis.

    x   : (R, H*W) f32   R rows = (batch-tile * channels), spatial flattened on lanes
    w   : (R, 9)   f32   per-row 3x3 taps, flattened row-major over (dy+1, dx+1)
    b   : (R, 1)   f32   per-row bias
    row : (1, H*W) i32   h index of each flattened position
    col : (1, H*W) i32   w index of each flattened position
    """
    R, HW = x.shape
    acc = None
    for dy in (-1, 0, 1):
        for dx in (-1, 0, 1):
            d = dy * W + dx                      # flat offset of this tap
            # shifted[p] == x[p + d]   (circular; out-of-range taps are masked below)
            shifted = x if d == 0 else pltpu.roll(x, shift=(-d) % HW, axis=1)
            k = (dy + 1) * 3 + (dx + 1)
            contrib = shifted * w[:, k:k + 1]    # per-row (per-channel) tap weight
            conds = []
            if dy == -1:
                conds.append(row >= 1)
            if dy == 1:
                conds.append(row <= H - 2)
            if dx == -1:
                conds.append(col >= 1)
            if dx == 1:
                conds.append(col <= W - 2)
            if conds:
                mask = conds[0]
                for c in conds[1:]:
                    mask = mask & c
                contrib = jnp.where(mask, contrib, 0.0)
            acc = contrib if acc is None else acc + contrib
    return acc + b


def _pick_batch_tile(N, C, HW, bytes_budget=2 * 1024 * 1024):
    """Largest divisor NB of N whose (NB*C, H*W) f32 block fits the budget.

    Keeps the per-step input block <= ~2 MiB so that (in + out) x double-buffering
    stays well under the default scoped-VMEM limit on every generation
    (16 MiB v5e, 32 MiB v6e/v7x, 64 MiB physical on v7x).
    """
    best = 1
    for nb in range(1, N + 1):
        if N % nb == 0 and nb * C * HW * 4 <= bytes_budget:
            best = nb
    return best


# ----------------------------------------------------------------------------- kernels


def stats_kernel(x_ref, w_ref, b_ref, rc_ref, sums_ref, *, H, W):
    """Pass 1: depthwise conv (recomputed, never stored to HBM) -> per-row sums.

    x_ref    : (1, R, H*W)   one batch tile, rows = (sample-in-tile, channel)
    w_ref    : (R, 9)
    b_ref    : (R, 1)
    rc_ref   : (2, H*W)      int32 [row_index; col_index]
    sums_ref : (1, R, 2)     per-row [sum, sum_of_squares] of the conv output
    """
    x = x_ref[0].astype(jnp.float32)
    conv = _depthwise3x3(x, w_ref[...], b_ref[...],
                         rc_ref[0:1, :], rc_ref[1:2, :], H, W)
    sums_ref[0, :, 0:1] = jnp.sum(conv, axis=1, keepdims=True)
    sums_ref[0, :, 1:2] = jnp.sum(conv * conv, axis=1, keepdims=True)


def fused_kernel(x_ref, w_ref, b_ref, rc_ref, scale_ref, shift_ref, out_ref, *, H, W):
    """Pass 2: recompute conv, apply folded BN (scale/shift), max with input.

    scale_ref/shift_ref : (R, 1) precomputed gamma*rsqrt(var+eps), beta-mean*scale
    out_ref             : (1, R, H*W)
    """
    x = x_ref[0].astype(jnp.float32)
    conv = _depthwise3x3(x, w_ref[...], b_ref[...],
                         rc_ref[0:1, :], rc_ref[1:2, :], H, W)
    branch = conv * scale_ref[...] + shift_ref[...]
    out_ref[0] = jnp.maximum(x, branch).astype(out_ref.dtype)


# ----------------------------------------------------------------------------- wrapper


def frelu_forward(x_nchw, w_oihw, bias, gamma, beta, eps=1e-5):
    """FReLU forward.  x_nchw: (N, C, H, W).  Returns (N, C, H, W)."""
    N, C, H, W = x_nchw.shape
    HW = H * W
    NB = _pick_batch_tile(N, C, HW)      # batch-tile size (NB | N)
    G = N // NB                          # grid length (parallel across TCs on v7x)
    R = NB * C                           # sublane rows per block

    # Pure contiguous reshapes / tiny parameter prep (no HBM-sized copies).
    x3 = x_nchw.reshape(G, R, HW)
    w_t = jnp.tile(w_oihw[:, 0].reshape(C, 9).astype(jnp.float32), (NB, 1))   # (R, 9)
    b_t = jnp.tile(bias.reshape(C, 1).astype(jnp.float32), (NB, 1))           # (R, 1)
    p = jnp.arange(HW, dtype=jnp.int32)
    rc = jnp.stack([p // W, p % W], axis=0)                                   # (2, HW)

    # --- pass 1: per-batch-tile conv statistics (no conv tensor written to HBM) ---
    partials = pl.pallas_call(
        functools.partial(stats_kernel, H=H, W=W),
        out_shape=jax.ShapeDtypeStruct((G, R, 2), jnp.float32),
        grid=(G,),
        in_specs=[
            pl.BlockSpec((1, R, HW), lambda i: (i, 0, 0)),
            pl.BlockSpec((R, 9), lambda i: (0, 0)),
            pl.BlockSpec((R, 1), lambda i: (0, 0)),
            pl.BlockSpec((2, HW), lambda i: (0, 0)),
        ],
        out_specs=pl.BlockSpec((1, R, 2), lambda i: (i, 0, 0)),
        compiler_params=pltpu.CompilerParams(dimension_semantics=("parallel",)),
    )(x3, w_t, b_t, rc)

    # --- fold BN into per-channel scale/shift once (tiny (C,) ops in the wrapper) ---
    count = float(N * H * W)
    sums = partials.reshape(N, C, 2).sum(axis=0)                  # (C, 2)
    mean = sums[:, 0] / count
    var = jnp.maximum(sums[:, 1] / count - mean * mean, 0.0)      # clamp cancellation
    scale = gamma.astype(jnp.float32) * jax.lax.rsqrt(var + eps)  # (C,)
    shift = beta.astype(jnp.float32) - mean * scale               # (C,)
    scale_t = jnp.tile(scale.reshape(C, 1), (NB, 1))              # (R, 1)
    shift_t = jnp.tile(shift.reshape(C, 1), (NB, 1))              # (R, 1)

    # --- pass 2: fused conv-recompute + BN + max, lane-dense output ---
    out3 = pl.pallas_call(
        functools.partial(fused_kernel, H=H, W=W),
        out_shape=jax.ShapeDtypeStruct((G, R, HW), x_nchw.dtype),
        grid=(G,),
        in_specs=[
            pl.BlockSpec((1, R, HW), lambda i: (i, 0, 0)),
            pl.BlockSpec((R, 9), lambda i: (0, 0)),
            pl.BlockSpec((R, 1), lambda i: (0, 0)),
            pl.BlockSpec((2, HW), lambda i: (0, 0)),
            pl.BlockSpec((R, 1), lambda i: (0, 0)),
            pl.BlockSpec((R, 1), lambda i: (0, 0)),
        ],
        out_specs=pl.BlockSpec((1, R, HW), lambda i: (i, 0, 0)),
        compiler_params=pltpu.CompilerParams(dimension_semantics=("parallel",)),
    )(x3, w_t, b_t, rc, scale_t, shift_t)

    return out3.reshape(N, C, H, W)


# ----------------------------------------------------------------------------- reference


def _reference_frelu(x, w_oihw, bias, gamma, beta, eps):
    """Plain-JAX reference of the PyTorch module (training-mode BN)."""
    N, C, H, W = x.shape
    conv = jax.lax.conv_general_dilated(
        x, w_oihw, window_strides=(1, 1), padding=((1, 1), (1, 1)),
        dimension_numbers=("NCHW", "OIHW", "NCHW"), feature_group_count=C)
    conv = conv + bias.reshape(1, C, 1, 1)
    mean = conv.mean(axis=(0, 2, 3), keepdims=True)
    var = jnp.mean((conv - mean) ** 2, axis=(0, 2, 3), keepdims=True)
    branch = ((conv - mean) * jax.lax.rsqrt(var + eps)
              * gamma.reshape(1, C, 1, 1) + beta.reshape(1, C, 1, 1))
    return jnp.maximum(x, branch)


if __name__ == "__main__":
    N, C, H, W = 2, 4, 16, 16

    key = jax.random.PRNGKey(0)
    kx, kw, kb = jax.random.split(key, 3)

    x = jax.random.normal(kx, (N, C, H, W), dtype=jnp.float32)

    # Deterministic parameter init mirroring the PyTorch module's __init__:
    #   conv.weight : (C, 1, 3, 3), xavier_normal_(gain=1.0) -> std = sqrt(2/(9+9)) = 1/3
    #   conv.bias   : uniform(-1/sqrt(fan_in), 1/sqrt(fan_in)), fan_in = 9
    #   bn.weight   : ones, bn.bias : zeros (BatchNorm2d defaults)
    w_oihw = jax.random.normal(kw, (C, 1, 3, 3), dtype=jnp.float32) * (1.0 / 3.0)
    bias = jax.random.uniform(kb, (C,), dtype=jnp.float32,
                              minval=-1.0 / 3.0, maxval=1.0 / 3.0)
    gamma = jnp.ones((C,), dtype=jnp.float32)
    beta = jnp.zeros((C,), dtype=jnp.float32)

    out = jax.jit(frelu_forward)(x, w_oihw, bias, gamma, beta)
    jax.block_until_ready(out)
    assert out.shape == (N, C, H, W)

    ref = _reference_frelu(x, w_oihw, bias, gamma, beta, 1e-5)
    err = float(jnp.max(jnp.abs(out - ref)))
    assert jnp.allclose(out, ref, atol=1e-4, rtol=1e-4), f"max abs err {err}"

    print("KERNEL_OK")
</pallas_src>

<mosaic_0001>
module attributes {stable_mosaic.version = 11 : i64} {
  func.func @stats_kernel(%arg0: i32, %arg1: memref<1x8x256xf32, #tpu.memory_space<vmem>>, %arg2: memref<8x9xf32, #tpu.memory_space<vmem>>, %arg3: memref<8x1xf32, #tpu.memory_space<vmem>>, %arg4: memref<2x256xi32, #tpu.memory_space<vmem>>, %arg5: memref<1x8x2xf32, #tpu.memory_space<vmem>>) attributes {dimension_semantics = [#tpu.dimension_semantics<parallel>], iteration_bounds = array<i64: 1>, scalar_prefetch = 0 : i64, scratch_operands = 0 : i64, tpu.core_type = #tpu.core_type<tc>, window_params = [{transform_indices = @transform_0, window_bounds = array<i64: 1, 8, 256>}, {pipeline_mode = #tpu.pipeline_mode<synchronous>, transform_indices = @transform_1, window_bounds = array<i64: 8, 9>}, {pipeline_mode = #tpu.pipeline_mode<synchronous>, transform_indices = @transform_2, window_bounds = array<i64: 8, 1>}, {pipeline_mode = #tpu.pipeline_mode<synchronous>, transform_indices = @transform_3, window_bounds = array<i64: 2, 256>}, {transform_indices = @transform_4, window_bounds = array<i64: 1, 8, 2>}]} {
    %c0 = arith.constant 0 : index
    %c0_0 = arith.constant 0 : index
    %c0_1 = arith.constant 0 : index
    %0 = vector.load %arg1[%c0, %c0_0, %c0_1] : memref<1x8x256xf32, #tpu.memory_space<vmem>>, vector<1x8x256xf32>
    %1 = vector.shape_cast %0 : vector<1x8x256xf32> to vector<8x256xf32>
    %c0_2 = arith.constant 0 : index
    %c0_3 = arith.constant 0 : index
    %2 = vector.load %arg2[%c0_2, %c0_3] : memref<8x9xf32, #tpu.memory_space<vmem>>, vector<8x9xf32>
    %c0_4 = arith.constant 0 : index
    %c0_5 = arith.constant 0 : index
    %3 = vector.load %arg3[%c0_4, %c0_5] : memref<8x1xf32, #tpu.memory_space<vmem>>, vector<8x1xf32>
    %c0_6 = arith.constant 0 : index
    %c0_7 = arith.constant 0 : index
    %4 = vector.load %arg4[%c0_6, %c0_7] : memref<2x256xi32, #tpu.memory_space<vmem>>, vector<1x256xi32>
    %c1 = arith.constant 1 : index
    %c0_8 = arith.constant 0 : index
    %5 = vector.load %arg4[%c1, %c0_8] : memref<2x256xi32, #tpu.memory_space<vmem>>, vector<1x256xi32>
    %c17_i32 = arith.constant 17 : i32
    %6 = tpu.dynamic_rotate %1 by %c17_i32 dim 1 : vector<8x256xf32>, i32 -> vector<8x256xf32>
    %7 = vector.extract_strided_slice %2 {offsets = [0, 0], sizes = [8, 1], strides = [1, 1]} : vector<8x9xf32> to vector<8x1xf32>
    %8 = vector.broadcast %7 : vector<8x1xf32> to vector<8x256xf32>
    %9 = arith.mulf %6, %8 : vector<8x256xf32>
    %c1_i32 = arith.constant 1 : i32
    %10 = vector.broadcast %c1_i32 : i32 to vector<1x256xi32>
    %11 = arith.cmpi sge, %4, %10 : vector<1x256xi32>
    %c1_i32_9 = arith.constant 1 : i32
    %12 = vector.broadcast %c1_i32_9 : i32 to vector<1x256xi32>
    %13 = arith.cmpi sge, %5, %12 : vector<1x256xi32>
    %14 = arith.andi %11, %13 : vector<1x256xi1>
    %cst = arith.constant 0.000000e+00 : f32
    %15 = vector.shape_cast %14 : vector<1x256xi1> to vector<1x256xi1>
    %16 = vector.broadcast %15 : vector<1x256xi1> to vector<8x256xi1>
    %17 = vector.broadcast %cst : f32 to vector<8x256xf32>
    %18 = arith.select %16, %9, %17 : vector<8x256xi1>, vector<8x256xf32>
    %c16_i32 = arith.constant 16 : i32
    %19 = tpu.dynamic_rotate %1 by %c16_i32 dim 1 : vector<8x256xf32>, i32 -> vector<8x256xf32>
    %20 = vector.extract_strided_slice %2 {offsets = [0, 1], sizes = [8, 1], strides = [1, 1]} : vector<8x9xf32> to vector<8x1xf32>
    %21 = vector.broadcast %20 : vector<8x1xf32> to vector<8x256xf32>
    %22 = arith.mulf %19, %21 : vector<8x256xf32>
    %c1_i32_10 = arith.constant 1 : i32
    %23 = vector.broadcast %c1_i32_10 : i32 to vector<1x256xi32>
    %24 = arith.cmpi sge, %4, %23 : vector<1x256xi32>
    %cst_11 = arith.constant 0.000000e+00 : f32
    %25 = vector.shape_cast %24 : vector<1x256xi1> to vector<1x256xi1>
    %26 = vector.broadcast %25 : vector<1x256xi1> to vector<8x256xi1>
    %27 = vector.broadcast %cst_11 : f32 to vector<8x256xf32>
    %28 = arith.select %26, %22, %27 : vector<8x256xi1>, vector<8x256xf32>
    %29 = arith.addf %18, %28 : vector<8x256xf32>
    %c15_i32 = arith.constant 15 : i32
    %30 = tpu.dynamic_rotate %1 by %c15_i32 dim 1 : vector<8x256xf32>, i32 -> vector<8x256xf32>
    %31 = vector.extract_strided_slice %2 {offsets = [0, 2], sizes = [8, 1], strides = [1, 1]} : vector<8x9xf32> to vector<8x1xf32>
    %32 = vector.broadcast %31 : vector<8x1xf32> to vector<8x256xf32>
    %33 = arith.mulf %30, %32 : vector<8x256xf32>
    %c1_i32_12 = arith.constant 1 : i32
    %34 = vector.broadcast %c1_i32_12 : i32 to vector<1x256xi32>
    %35 = arith.cmpi sge, %4, %34 : vector<1x256xi32>
    %c14_i32 = arith.constant 14 : i32
    %36 = vector.broadcast %c14_i32 : i32 to vector<1x256xi32>
    %37 = arith.cmpi sle, %5, %36 : vector<1x256xi32>
    %38 = arith.andi %35, %37 : vector<1x256xi1>
    %cst_13 = arith.constant 0.000000e+00 : f32
    %39 = vector.shape_cast %38 : vector<1x256xi1> to vector<1x256xi1>
    %40 = vector.broadcast %39 : vector<1x256xi1> to vector<8x256xi1>
    %41 = vector.broadcast %cst_13 : f32 to vector<8x256xf32>
    %42 = arith.select %40, %33, %41 : vector<8x256xi1>, vector<8x256xf32>
    %43 = arith.addf %29, %42 : vector<8x256xf32>
    %c1_i32_14 = arith.constant 1 : i32
    %44 = tpu.dynamic_rotate %1 by %c1_i32_14 dim 1 : vector<8x256xf32>, i32 -> vector<8x256xf32>
    %45 = vector.extract_strided_slice %2 {offsets = [0, 3], sizes = [8, 1], strides = [1, 1]} : vector<8x9xf32> to vector<8x1xf32>
    %46 = vector.broadcast %45 : vector<8x1xf32> to vector<8x256xf32>
    %47 = arith.mulf %44, %46 : vector<8x256xf32>
    %c1_i32_15 = arith.constant 1 : i32
    %48 = vector.broadcast %c1_i32_15 : i32 to vector<1x256xi32>
    %49 = arith.cmpi sge, %5, %48 : vector<1x256xi32>
    %cst_16 = arith.constant 0.000000e+00 : f32
    %50 = vector.shape_cast %49 : vector<1x256xi1> to vector<1x256xi1>
    %51 = vector.broadcast %50 : vector<1x256xi1> to vector<8x256xi1>
    %52 = vector.broadcast %cst_16 : f32 to vector<8x256xf32>
    %53 = arith.select %51, %47, %52 : vector<8x256xi1>, vector<8x256xf32>
    %54 = arith.addf %43, %53 : vector<8x256xf32>
    %55 = vector.extract_strided_slice %2 {offsets = [0, 4], sizes = [8, 1], strides = [1, 1]} : vector<8x9xf32> to vector<8x1xf32>
    %56 = vector.broadcast %55 : vector<8x1xf32> to vector<8x256xf32>
    %57 = arith.mulf %1, %56 : vector<8x256xf32>
    %58 = arith.addf %54, %57 : vector<8x256xf32>
    %c255_i32 = arith.constant 255 : i32
    %59 = tpu.dynamic_rotate %1 by %c255_i32 dim 1 : vector<8x256xf32>, i32 -> vector<8x256xf32>
    %60 = vector.extract_strided_slice %2 {offsets = [0, 5], sizes = [8, 1], strides = [1, 1]} : vector<8x9xf32> to vector<8x1xf32>
    %61 = vector.broadcast %60 : vector<8x1xf32> to vector<8x256xf32>
    %62 = arith.mulf %59, %61 : vector<8x256xf32>
    %c14_i32_17 = arith.constant 14 : i32
    %63 = vector.broadcast %c14_i32_17 : i32 to vector<1x256xi32>
    %64 = arith.cmpi sle, %5, %63 : vector<1x256xi32>
    %cst_18 = arith.constant 0.000000e+00 : f32
    %65 = vector.shape_cast %64 : vector<1x256xi1> to vector<1x256xi1>
    %66 = vector.broadcast %65 : vector<1x256xi1> to vector<8x256xi1>
    %67 = vector.broadcast %cst_18 : f32 to vector<8x256xf32>
    %68 = arith.select %66, %62, %67 : vector<8x256xi1>, vector<8x256xf32>
    %69 = arith.addf %58, %68 : vector<8x256xf32>
    %c241_i32 = arith.constant 241 : i32
    %70 = tpu.dynamic_rotate %1 by %c241_i32 dim 1 : vector<8x256xf32>, i32 -> vector<8x256xf32>
    %71 = vector.extract_strided_slice %2 {offsets = [0, 6], sizes = [8, 1], strides = [1, 1]} : vector<8x9xf32> to vector<8x1xf32>
    %72 = vector.broadcast %71 : vector<8x1xf32> to vector<8x256xf32>
    %73 = arith.mulf %70, %72 : vector<8x256xf32>
    %c14_i32_19 = arith.constant 14 : i32
    %74 = vector.broadcast %c14_i32_19 : i32 to vector<1x256xi32>
    %75 = arith.cmpi sle, %4, %74 : vector<1x256xi32>
    %c1_i32_20 = arith.constant 1 : i32
    %76 = vector.broadcast %c1_i32_20 : i32 to vector<1x256xi32>
    %77 = arith.cmpi sge, %5, %76 : vector<1x256xi32>
    %78 = arith.andi %75, %77 : vector<1x256xi1>
    %cst_21 = arith.constant 0.000000e+00 : f32
    %79 = vector.shape_cast %78 : vector<1x256xi1> to vector<1x256xi1>
    %80 = vector.broadcast %79 : vector<1x256xi1> to vector<8x256xi1>
    %81 = vector.broadcast %cst_21 : f32 to vector<8x256xf32>
    %82 = arith.select %80, %73, %81 : vector<8x256xi1>, vector<8x256xf32>
    %83 = arith.addf %69, %82 : vector<8x256xf32>
    %c240_i32 = arith.constant 240 : i32
    %84 = tpu.dynamic_rotate %1 by %c240_i32 dim 1 : vector<8x256xf32>, i32 -> vector<8x256xf32>
    %85 = vector.extract_strided_slice %2 {offsets = [0, 7], sizes = [8, 1], strides = [1, 1]} : vector<8x9xf32> to vector<8x1xf32>
    %86 = vector.broadcast %85 : vector<8x1xf32> to vector<8x256xf32>
    %87 = arith.mulf %84, %86 : vector<8x256xf32>
    %c14_i32_22 = arith.constant 14 : i32
    %88 = vector.broadcast %c14_i32_22 : i32 to vector<1x256xi32>
    %89 = arith.cmpi sle, %4, %88 : vector<1x256xi32>
    %cst_23 = arith.constant 0.000000e+00 : f32
    %90 = vector.shape_cast %89 : vector<1x256xi1> to vector<1x256xi1>
    %91 = vector.broadcast %90 : vector<1x256xi1> to vector<8x256xi1>
    %92 = vector.broadcast %cst_23 : f32 to vector<8x256xf32>
    %93 = arith.select %91, %87, %92 : vector<8x256xi1>, vector<8x256xf32>
    %94 = arith.addf %83, %93 : vector<8x256xf32>
    %c239_i32 = arith.constant 239 : i32
    %95 = tpu.dynamic_rotate %1 by %c239_i32 dim 1 : vector<8x256xf32>, i32 -> vector<8x256xf32>
    %96 = vector.extract_strided_slice %2 {offsets = [0, 8], sizes = [8, 1], strides = [1, 1]} : vector<8x9xf32> to vector<8x1xf32>
    %97 = vector.broadcast %96 : vector<8x1xf32> to vector<8x256xf32>
    %98 = arith.mulf %95, %97 : vector<8x256xf32>
    %c14_i32_24 = arith.constant 14 : i32
    %99 = vector.broadcast %c14_i32_24 : i32 to vector<1x256xi32>
    %100 = arith.cmpi sle, %4, %99 : vector<1x256xi32>
    %c14_i32_25 = arith.constant 14 : i32
    %101 = vector.broadcast %c14_i32_25 : i32 to vector<1x256xi32>
    %102 = arith.cmpi sle, %5, %101 : vector<1x256xi32>
    %103 = arith.andi %100, %102 : vector<1x256xi1>
    %cst_26 = arith.constant 0.000000e+00 : f32
    %104 = vector.shape_cast %103 : vector<1x256xi1> to vector<1x256xi1>
    %105 = vector.broadcast %104 : vector<1x256xi1> to vector<8x256xi1>
    %106 = vector.broadcast %cst_26 : f32 to vector<8x256xf32>
    %107 = arith.select %105, %98, %106 : vector<8x256xi1>, vector<8x256xf32>
    %108 = arith.addf %94, %107 : vector<8x256xf32>
    %109 = vector.broadcast %3 : vector<8x1xf32> to vector<8x256xf32>
    %110 = arith.addf %108, %109 : vector<8x256xf32>
    %cst_27 = arith.constant dense<0.000000e+00> : vector<8xf32>
    %111 = vector.multi_reduction <add>, %110, %cst_27 [1] : vector<8x256xf32> to vector<8xf32>
    %112 = vector.shape_cast %111 : vector<8xf32> to vector<8x1xf32>
    %c0_28 = arith.constant 0 : index
    %c0_29 = arith.constant 0 : index
    %c0_30 = arith.constant 0 : index
    %113 = vector.load %arg5[%c0_28, %c0_29, %c0_30] : memref<1x8x2xf32, #tpu.memory_space<vmem>>, vector<1x8x1xf32>
    %114 = vector.shape_cast %113 : vector<1x8x1xf32> to vector<8x1xf32>
    %115 = vector.shape_cast %112 : vector<8x1xf32> to vector<1x8x1xf32>
    tpu.vector_store %arg5[%c0_28, %c0_29, %c0_30], %115 {strides = array<i32>} : memref<1x8x2xf32, #tpu.memory_space<vmem>>, vector<1x8x1xf32>,
    %116 = arith.mulf %110, %110 : vector<8x256xf32>
    %cst_31 = arith.constant dense<0.000000e+00> : vector<8xf32>
    %117 = vector.multi_reduction <add>, %116, %cst_31 [1] : vector<8x256xf32> to vector<8xf32>
    %118 = vector.shape_cast %117 : vector<8xf32> to vector<8x1xf32>
    %c0_32 = arith.constant 0 : index
    %c0_33 = arith.constant 0 : index
    %c1_34 = arith.constant 1 : index
    %119 = vector.load %arg5[%c0_32, %c0_33, %c1_34] : memref<1x8x2xf32, #tpu.memory_space<vmem>>, vector<1x8x1xf32>
    %120 = vector.shape_cast %119 : vector<1x8x1xf32> to vector<8x1xf32>
    %121 = vector.shape_cast %118 : vector<8x1xf32> to vector<1x8x1xf32>
    tpu.vector_store %arg5[%c0_32, %c0_33, %c1_34], %121 {strides = array<i32>} : memref<1x8x2xf32, #tpu.memory_space<vmem>>, vector<1x8x1xf32>,
    return
  }
  func.func @transform_0(%arg0: i32) -> (i32, i32, i32) {
    %c0_i32 = arith.constant 0 : i32
    %c0_i32_0 = arith.constant 0 : i32
    %c0_i32_1 = arith.constant 0 : i32
    return %arg0, %c0_i32, %c0_i32_0 : i32, i32, i32
  }
  func.func @transform_1(%arg0: i32) -> (i32, i32) {
    %c0_i32 = arith.constant 0 : i32
    %c0_i32_0 = arith.constant 0 : i32
    %c0_i32_1 = arith.constant 0 : i32
    return %c0_i32, %c0_i32_0 : i32, i32
  }
  func.func @transform_2(%arg0: i32) -> (i32, i32) {
    %c0_i32 = arith.constant 0 : i32
    %c0_i32_0 = arith.constant 0 : i32
    %c0_i32_1 = arith.constant 0 : i32
    return %c0_i32, %c0_i32_0 : i32, i32
  }
  func.func @transform_3(%arg0: i32) -> (i32, i32) {
    %c0_i32 = arith.constant 0 : i32
    %c0_i32_0 = arith.constant 0 : i32
    %c0_i32_1 = arith.constant 0 : i32
    return %c0_i32, %c0_i32_0 : i32, i32
  }
  func.func @transform_4(%arg0: i32) -> (i32, i32, i32) {
    %c0_i32 = arith.constant 0 : i32
    %c0_i32_0 = arith.constant 0 : i32
    %c0_i32_1 = arith.constant 0 : i32
    return %arg0, %c0_i32, %c0_i32_0 : i32, i32, i32
  }
}

module attributes {stable_mosaic.version = 11 : i64} {
  func.func @fused_kernel(%arg0: i32, %arg1: memref<1x8x256xf32, #tpu.memory_space<vmem>>, %arg2: memref<8x9xf32, #tpu.memory_space<vmem>>, %arg3: memref<8x1xf32, #tpu.memory_space<vmem>>, %arg4: memref<2x256xi32, #tpu.memory_space<vmem>>, %arg5: memref<8x1xf32, #tpu.memory_space<vmem>>, %arg6: memref<8x1xf32, #tpu.memory_space<vmem>>, %arg7: memref<1x8x256xf32, #tpu.memory_space<vmem>>) attributes {dimension_semantics = [#tpu.dimension_semantics<parallel>], iteration_bounds = array<i64: 1>, scalar_prefetch = 0 : i64, scratch_operands = 0 : i64, tpu.core_type = #tpu.core_type<tc>, window_params = [{transform_indices = @transform_0, window_bounds = array<i64: 1, 8, 256>}, {pipeline_mode = #tpu.pipeline_mode<synchronous>, transform_indices = @transform_1, window_bounds = array<i64: 8, 9>}, {pipeline_mode = #tpu.pipeline_mode<synchronous>, transform_indices = @transform_2, window_bounds = array<i64: 8, 1>}, {pipeline_mode = #tpu.pipeline_mode<synchronous>, transform_indices = @transform_3, window_bounds = array<i64: 2, 256>}, {pipeline_mode = #tpu.pipeline_mode<synchronous>, transform_indices = @transform_4, window_bounds = array<i64: 8, 1>}, {pipeline_mode = #tpu.pipeline_mode<synchronous>, transform_indices = @transform_5, window_bounds = array<i64: 8, 1>}, {transform_indices = @transform_6, window_bounds = array<i64: 1, 8, 256>}]} {
    %c0 = arith.constant 0 : index
    %c0_0 = arith.constant 0 : index
    %c0_1 = arith.constant 0 : index
    %0 = vector.load %arg1[%c0, %c0_0, %c0_1] : memref<1x8x256xf32, #tpu.memory_space<vmem>>, vector<1x8x256xf32>
    %1 = vector.shape_cast %0 : vector<1x8x256xf32> to vector<8x256xf32>
    %c0_2 = arith.constant 0 : index
    %c0_3 = arith.constant 0 : index
    %2 = vector.load %arg2[%c0_2, %c0_3] : memref<8x9xf32, #tpu.memory_space<vmem>>, vector<8x9xf32>
    %c0_4 = arith.constant 0 : index
    %c0_5 = arith.constant 0 : index
    %3 = vector.load %arg3[%c0_4, %c0_5] : memref<8x1xf32, #tpu.memory_space<vmem>>, vector<8x1xf32>
    %c0_6 = arith.constant 0 : index
    %c0_7 = arith.constant 0 : index
    %4 = vector.load %arg4[%c0_6, %c0_7] : memref<2x256xi32, #tpu.memory_space<vmem>>, vector<1x256xi32>
    %c1 = arith.constant 1 : index
    %c0_8 = arith.constant 0 : index
    %5 = vector.load %arg4[%c1, %c0_8] : memref<2x256xi32, #tpu.memory_space<vmem>>, vector<1x256xi32>
    %c17_i32 = arith.constant 17 : i32
    %6 = tpu.dynamic_rotate %1 by %c17_i32 dim 1 : vector<8x256xf32>, i32 -> vector<8x256xf32>
    %7 = vector.extract_strided_slice %2 {offsets = [0, 0], sizes = [8, 1], strides = [1, 1]} : vector<8x9xf32> to vector<8x1xf32>
    %8 = vector.broadcast %7 : vector<8x1xf32> to vector<8x256xf32>
    %9 = arith.mulf %6, %8 : vector<8x256xf32>
    %c1_i32 = arith.constant 1 : i32
    %10 = vector.broadcast %c1_i32 : i32 to vector<1x256xi32>
    %11 = arith.cmpi sge, %4, %10 : vector<1x256xi32>
    %c1_i32_9 = arith.constant 1 : i32
    %12 = vector.broadcast %c1_i32_9 : i32 to vector<1x256xi32>
    %13 = arith.cmpi sge, %5, %12 : vector<1x256xi32>
    %14 = arith.andi %11, %13 : vector<1x256xi1>
    %cst = arith.constant 0.000000e+00 : f32
    %15 = vector.shape_cast %14 : vector<1x256xi1> to vector<1x256xi1>
    %16 = vector.broadcast %15 : vector<1x256xi1> to vector<8x256xi1>
    %17 = vector.broadcast %cst : f32 to vector<8x256xf32>
    %18 = arith.select %16, %9, %17 : vector<8x256xi1>, vector<8x256xf32>
    %c16_i32 = arith.constant 16 : i32
    %19 = tpu.dynamic_rotate %1 by %c16_i32 dim 1 : vector<8x256xf32>, i32 -> vector<8x256xf32>
    %20 = vector.extract_strided_slice %2 {offsets = [0, 1], sizes = [8, 1], strides = [1, 1]} : vector<8x9xf32> to vector<8x1xf32>
    %21 = vector.broadcast %20 : vector<8x1xf32> to vector<8x256xf32>
    %22 = arith.mulf %19, %21 : vector<8x256xf32>
    %c1_i32_10 = arith.constant 1 : i32
    %23 = vector.broadcast %c1_i32_10 : i32 to vector<1x256xi32>
    %24 = arith.cmpi sge, %4, %23 : vector<1x256xi32>
    %cst_11 = arith.constant 0.000000e+00 : f32
    %25 = vector.shape_cast %24 : vector<1x256xi1> to vector<1x256xi1>
    %26 = vector.broadcast %25 : vector<1x256xi1> to vector<8x256xi1>
    %27 = vector.broadcast %cst_11 : f32 to vector<8x256xf32>
    %28 = arith.select %26, %22, %27 : vector<8x256xi1>, vector<8x256xf32>
    %29 = arith.addf %18, %28 : vector<8x256xf32>
    %c15_i32 = arith.constant 15 : i32
    %30 = tpu.dynamic_rotate %1 by %c15_i32 dim 1 : vector<8x256xf32>, i32 -> vector<8x256xf32>
    %31 = vector.extract_strided_slice %2 {offsets = [0, 2], sizes = [8, 1], strides = [1, 1]} : vector<8x9xf32> to vector<8x1xf32>
    %32 = vector.broadcast %31 : vector<8x1xf32> to vector<8x256xf32>
    %33 = arith.mulf %30, %32 : vector<8x256xf32>
    %c1_i32_12 = arith.constant 1 : i32
    %34 = vector.broadcast %c1_i32_12 : i32 to vector<1x256xi32>
    %35 = arith.cmpi sge, %4, %34 : vector<1x256xi32>
    %c14_i32 = arith.constant 14 : i32
    %36 = vector.broadcast %c14_i32 : i32 to vector<1x256xi32>
    %37 = arith.cmpi sle, %5, %36 : vector<1x256xi32>
    %38 = arith.andi %35, %37 : vector<1x256xi1>
    %cst_13 = arith.constant 0.000000e+00 : f32
    %39 = vector.shape_cast %38 : vector<1x256xi1> to vector<1x256xi1>
    %40 = vector.broadcast %39 : vector<1x256xi1> to vector<8x256xi1>
    %41 = vector.broadcast %cst_13 : f32 to vector<8x256xf32>
    %42 = arith.select %40, %33, %41 : vector<8x256xi1>, vector<8x256xf32>
    %43 = arith.addf %29, %42 : vector<8x256xf32>
    %c1_i32_14 = arith.constant 1 : i32
    %44 = tpu.dynamic_rotate %1 by %c1_i32_14 dim 1 : vector<8x256xf32>, i32 -> vector<8x256xf32>
    %45 = vector.extract_strided_slice %2 {offsets = [0, 3], sizes = [8, 1], strides = [1, 1]} : vector<8x9xf32> to vector<8x1xf32>
    %46 = vector.broadcast %45 : vector<8x1xf32> to vector<8x256xf32>
    %47 = arith.mulf %44, %46 : vector<8x256xf32>
    %c1_i32_15 = arith.constant 1 : i32
    %48 = vector.broadcast %c1_i32_15 : i32 to vector<1x256xi32>
    %49 = arith.cmpi sge, %5, %48 : vector<1x256xi32>
    %cst_16 = arith.constant 0.000000e+00 : f32
    %50 = vector.shape_cast %49 : vector<1x256xi1> to vector<1x256xi1>
    %51 = vector.broadcast %50 : vector<1x256xi1> to vector<8x256xi1>
    %52 = vector.broadcast %cst_16 : f32 to vector<8x256xf32>
    %53 = arith.select %51, %47, %52 : vector<8x256xi1>, vector<8x256xf32>
    %54 = arith.addf %43, %53 : vector<8x256xf32>
    %55 = vector.extract_strided_slice %2 {offsets = [0, 4], sizes = [8, 1], strides = [1, 1]} : vector<8x9xf32> to vector<8x1xf32>
    %56 = vector.broadcast %55 : vector<8x1xf32> to vector<8x256xf32>
    %57 = arith.mulf %1, %56 : vector<8x256xf32>
    %58 = arith.addf %54, %57 : vector<8x256xf32>
    %c255_i32 = arith.constant 255 : i32
    %59 = tpu.dynamic_rotate %1 by %c255_i32 dim 1 : vector<8x256xf32>, i32 -> vector<8x256xf32>
    %60 = vector.extract_strided_slice %2 {offsets = [0, 5], sizes = [8, 1], strides = [1, 1]} : vector<8x9xf32> to vector<8x1xf32>
    %61 = vector.broadcast %60 : vector<8x1xf32> to vector<8x256xf32>
    %62 = arith.mulf %59, %61 : vector<8x256xf32>
    %c14_i32_17 = arith.constant 14 : i32
    %63 = vector.broadcast %c14_i32_17 : i32 to vector<1x256xi32>
    %64 = arith.cmpi sle, %5, %63 : vector<1x256xi32>
    %cst_18 = arith.constant 0.000000e+00 : f32
    %65 = vector.shape_cast %64 : vector<1x256xi1> to vector<1x256xi1>
    %66 = vector.broadcast %65 : vector<1x256xi1> to vector<8x256xi1>
    %67 = vector.broadcast %cst_18 : f32 to vector<8x256xf32>
    %68 = arith.select %66, %62, %67 : vector<8x256xi1>, vector<8x256xf32>
    %69 = arith.addf %58, %68 : vector<8x256xf32>
    %c241_i32 = arith.constant 241 : i32
    %70 = tpu.dynamic_rotate %1 by %c241_i32 dim 1 : vector<8x256xf32>, i32 -> vector<8x256xf32>
    %71 = vector.extract_strided_slice %2 {offsets = [0, 6], sizes = [8, 1], strides = [1, 1]} : vector<8x9xf32> to vector<8x1xf32>
    %72 = vector.broadcast %71 : vector<8x1xf32> to vector<8x256xf32>
    %73 = arith.mulf %70, %72 : vector<8x256xf32>
    %c14_i32_19 = arith.constant 14 : i32
    %74 = vector.broadcast %c14_i32_19 : i32 to vector<1x256xi32>
    %75 = arith.cmpi sle, %4, %74 : vector<1x256xi32>
    %c1_i32_20 = arith.constant 1 : i32
    %76 = vector.broadcast %c1_i32_20 : i32 to vector<1x256xi32>
    %77 = arith.cmpi sge, %5, %76 : vector<1x256xi32>
    %78 = arith.andi %75, %77 : vector<1x256xi1>
    %cst_21 = arith.constant 0.000000e+00 : f32
    %79 = vector.shape_cast %78 : vector<1x256xi1> to vector<1x256xi1>
    %80 = vector.broadcast %79 : vector<1x256xi1> to vector<8x256xi1>
    %81 = vector.broadcast %cst_21 : f32 to vector<8x256xf32>
    %82 = arith.select %80, %73, %81 : vector<8x256xi1>, vector<8x256xf32>
    %83 = arith.addf %69, %82 : vector<8x256xf32>
    %c240_i32 = arith.constant 240 : i32
    %84 = tpu.dynamic_rotate %1 by %c240_i32 dim 1 : vector<8x256xf32>, i32 -> vector<8x256xf32>
    %85 = vector.extract_strided_slice %2 {offsets = [0, 7], sizes = [8, 1], strides = [1, 1]} : vector<8x9xf32> to vector<8x1xf32>
    %86 = vector.broadcast %85 : vector<8x1xf32> to vector<8x256xf32>
    %87 = arith.mulf %84, %86 : vector<8x256xf32>
    %c14_i32_22 = arith.constant 14 : i32
    %88 = vector.broadcast %c14_i32_22 : i32 to vector<1x256xi32>
    %89 = arith.cmpi sle, %4, %88 : vector<1x256xi32>
    %cst_23 = arith.constant 0.000000e+00 : f32
    %90 = vector.shape_cast %89 : vector<1x256xi1> to vector<1x256xi1>
    %91 = vector.broadcast %90 : vector<1x256xi1> to vector<8x256xi1>
    %92 = vector.broadcast %cst_23 : f32 to vector<8x256xf32>
    %93 = arith.select %91, %87, %92 : vector<8x256xi1>, vector<8x256xf32>
    %94 = arith.addf %83, %93 : vector<8x256xf32>
    %c239_i32 = arith.constant 239 : i32
    %95 = tpu.dynamic_rotate %1 by %c239_i32 dim 1 : vector<8x256xf32>, i32 -> vector<8x256xf32>
    %96 = vector.extract_strided_slice %2 {offsets = [0, 8], sizes = [8, 1], strides = [1, 1]} : vector<8x9xf32> to vector<8x1xf32>
    %97 = vector.broadcast %96 : vector<8x1xf32> to vector<8x256xf32>
    %98 = arith.mulf %95, %97 : vector<8x256xf32>
    %c14_i32_24 = arith.constant 14 : i32
    %99 = vector.broadcast %c14_i32_24 : i32 to vector<1x256xi32>
    %100 = arith.cmpi sle, %4, %99 : vector<1x256xi32>
    %c14_i32_25 = arith.constant 14 : i32
    %101 = vector.broadcast %c14_i32_25 : i32 to vector<1x256xi32>
    %102 = arith.cmpi sle, %5, %101 : vector<1x256xi32>
    %103 = arith.andi %100, %102 : vector<1x256xi1>
    %cst_26 = arith.constant 0.000000e+00 : f32
    %104 = vector.shape_cast %103 : vector<1x256xi1> to vector<1x256xi1>
    %105 = vector.broadcast %104 : vector<1x256xi1> to vector<8x256xi1>
    %106 = vector.broadcast %cst_26 : f32 to vector<8x256xf32>
    %107 = arith.select %105, %98, %106 : vector<8x256xi1>, vector<8x256xf32>
    %108 = arith.addf %94, %107 : vector<8x256xf32>
    %109 = vector.broadcast %3 : vector<8x1xf32> to vector<8x256xf32>
    %110 = arith.addf %108, %109 : vector<8x256xf32>
    %c0_27 = arith.constant 0 : index
    %c0_28 = arith.constant 0 : index
    %111 = vector.load %arg5[%c0_27, %c0_28] : memref<8x1xf32, #tpu.memory_space<vmem>>, vector<8x1xf32>
    %112 = vector.broadcast %111 : vector<8x1xf32> to vector<8x256xf32>
    %113 = arith.mulf %110, %112 : vector<8x256xf32>
    %c0_29 = arith.constant 0 : index
    %c0_30 = arith.constant 0 : index
    %114 = vector.load %arg6[%c0_29, %c0_30] : memref<8x1xf32, #tpu.memory_space<vmem>>, vector<8x1xf32>
    %115 = vector.broadcast %114 : vector<8x1xf32> to vector<8x256xf32>
    %116 = arith.addf %113, %115 : vector<8x256xf32>
    %117 = arith.maximumf %1, %116 : vector<8x256xf32>
    %c0_31 = arith.constant 0 : index
    %c0_32 = arith.constant 0 : index
    %c0_33 = arith.constant 0 : index
    %118 = vector.load %arg7[%c0_31, %c0_32, %c0_33] : memref<1x8x256xf32, #tpu.memory_space<vmem>>, vector<1x8x256xf32>
    %119 = vector.shape_cast %118 : vector<1x8x256xf32> to vector<8x256xf32>
    %120 = vector.shape_cast %117 : vector<8x256xf32> to vector<1x8x256xf32>
    tpu.vector_store %arg7[%c0_31, %c0_32, %c0_33], %120 {strides = array<i32>} : memref<1x8x256xf32, #tpu.memory_space<vmem>>, vector<1x8x256xf32>,
    return
  }
  func.func @transform_0(%arg0: i32) -> (i32, i32, i32) {
    %c0_i32 = arith.constant 0 : i32
    %c0_i32_0 = arith.constant 0 : i32
    %c0_i32_1 = arith.constant 0 : i32
    return %arg0, %c0_i32, %c0_i32_0 : i32, i32, i32
  }
  func.func @transform_1(%arg0: i32) -> (i32, i32) {
    %c0_i32 = arith.constant 0 : i32
    %c0_i32_0 = arith.constant 0 : i32
    %c0_i32_1 = arith.constant 0 : i32
    return %c0_i32, %c0_i32_0 : i32, i32
  }
  func.func @transform_2(%arg0: i32) -> (i32, i32) {
    %c0_i32 = arith.constant 0 : i32
    %c0_i32_0 = arith.constant 0 : i32
    %c0_i32_1 = arith.constant 0 : i32
    return %c0_i32, %c0_i32_0 : i32, i32
  }
  func.func @transform_3(%arg0: i32) -> (i32, i32) {
    %c0_i32 = arith.constant 0 : i32
    %c0_i32_0 = arith.constant 0 : i32
    %c0_i32_1 = arith.constant 0 : i32
    return %c0_i32, %c0_i32_0 : i32, i32
  }
  func.func @transform_4(%arg0: i32) -> (i32, i32) {
    %c0_i32 = arith.constant 0 : i32
    %c0_i32_0 = arith.constant 0 : i32
    %c0_i32_1 = arith.constant 0 : i32
    return %c0_i32, %c0_i32_0 : i32, i32
  }
  func.func @transform_5(%arg0: i32) -> (i32, i32) {
    %c0_i32 = arith.constant 0 : i32
    %c0_i32_0 = arith.constant 0 : i32
    %c0_i32_1 = arith.constant 0 : i32
    return %c0_i32, %c0_i32_0 : i32, i32
  }
  func.func @transform_6(%arg0: i32) -> (i32, i32, i32) {
    %c0_i32 = arith.constant 0 : i32
    %c0_i32_0 = arith.constant 0 : i32
    %c0_i32_1 = arith.constant 0 : i32
    return %arg0, %c0_i32, %c0_i32_0 : i32, i32, i32
  }
}

</mosaic_0001>

<bundles_post_ra>
// kernel: frelu_forward.2
= control target key start
LH: loop header
LB: loop body
LE: loop exit
PB: predicated region body
PF: predicated region fallthrough
CT: control target
= control target key end

     0   :  { %v316_v0 = vmov 2   ;;  %v317_v1 = vmov 0   ;;  %v318_v3 = vmov 3   ;;  %v319_v4 = vmov 1   ;;  %s320_s21 = smov 17   ;;  %s324_s22 = smov 15   ;;  %s606_s1 = inlined_call_operand.vmem [shape: f32[8,9], index: 1, kind: input, shape index: {}]   ;;  %s607_s0 = inlined_call_operand.vmem [shape: f32[1,8,256], index: 0, kind: input, shape index: {}]   ;;  %s608_s2 = inlined_call_operand.vmem [shape: f32[8,1], index: 2, kind: input, shape index: {}]   ;;  %s609_s3 = inlined_call_operand.vmem [shape: s32[2,256], index: 3, kind: input, shape index: {}]   ;;  %s610_s4 = inlined_call_operand.vmem [shape: f32[1,8,2], index: 4, kind: output, shape index: {}]  }
   0x1   :  { %308 = vset.pattern.permute.xlu1 %v316_v0  ;;  %306 = vset.pattern.permute.xlu0 %v317_v1  ;;  %v19_v2 = vld [vmem:[%s606_s1] sm:$0xff]  ;;  %v370_v6 = vld [vmem:[%s607_s0 + $0x8] sm:$0xff]  ;;  %v321_v7 = vmov 4   ;;  %v322_v8 = vmov 5   ;;  %s323_s1 = smov 16   ;;  %v325_v9 = vmov 7   ;;  %v28_v24 = vlaneseq }
   0x2   :  { %92 = vperm.xlu1 %308, %v19_v2   ;;  %35 = vperm.xlu0 %306, %v19_v2   ;;  %v365_v5 = vld [vmem:[%s607_s0] sm:$0xff]  ;;  %s326_s0 = smov 1   ;;  %v327_v10 = vmov 6   ;;  %s328_s23 = smov 127   ;;  %v330_v11 = vmov 8  }
   0x3   :  { %s329_s24 = smov 113   ;;  %s331_s25 = smov 112   ;;  %v20_v12 = vld [vmem:[%s608_s2] sm:$0xff]  ;;  %v45_v27 = vshrl.u32 %v28_v24, 7  ;;  %v423_v34 = vand.u32 127, %v28_v24 }
   0x4   :  { %s332_s28 = smov 111   ;;  %v403_v22 = vld [vmem:[%s609_s3] ss:$2 sm:$0x3] }
   0x5   :  { %v408_v23 = vld [vmem:[%s609_s3 + $0x1] ss:$2 sm:$0x3]  ;;  %vm40_vm0 = vcmp.ge.s32.totalorder %v403_v22, 1  ;;  %v416_v30 = vsub.s32 0, %v45_v27  ;;  %v418_v31 = vsub.s32 1, %v45_v27 }
   0x6   :  { %309 = vset.pattern.permute.xlu1 %v318_v3  ;;  %307 = vset.pattern.permute.xlu0 %v319_v4  ;;  %vm41_vm1 = vcmp.ge.s32.totalorder %v408_v23, 1  ;;  %vm97_vm3 = vcmp.le.s32.totalorder %v408_v23, 14  ;;  %v69_v33 = vsel %vm40_vm0, 1, %v317_v1  ;;  %vm30_vm5 = vcmp.lt.s32.totalorder %v423_v34, 17 }
   0x7   :  { %122 = vperm.xlu1 %309, %v19_v2   ;;  %64 = vperm.xlu0 %307, %v19_v2   ;;  %vm42_vm2 = vmand %vm40_vm0, %vm41_vm1  ;;  %v73_v38 = vrot.slane %v69_v33, %v416_v30  ;;  %v77_v40 = vrot.slane %v69_v33, %v418_v31  ;;  %vm60_vm6 = vcmp.lt.s32.totalorder %v423_v34, 16  ;;  %v127_v42 = vsel %vm41_vm1, 1, %v317_v1 }
   0x8   :  { %v43_v32 = vsel %vm42_vm2, 1, %v317_v1  ;;  %vm98_vm4 = vmand %vm40_vm0, %vm97_vm3  ;;  %v163_v46 = vsel %vm97_vm3, 1, %v317_v1  ;;  %vm191_vm9 = vcmp.le.s32.totalorder %v403_v22, 14  ;;  %vm88_vm11 = vcmp.lt.s32.totalorder %v423_v34, 15 }
   0x9   :  { %v47_v36 = vrot.slane %v43_v32, %v416_v30  ;;  %v51_v37 = vrot.slane %v43_v32, %v418_v31  ;;  %v99_v41 = vsel %vm98_vm4, 1, %v317_v1  ;;  %vm453_vm10 = vcmp.eq.s32.totalorder %v73_v38, 1  ;;  %vm192_vm14 = vmand %vm191_vm9, %vm41_vm1 }
   0xa   :  { %v103_v48 = vrot.slane %v99_v41, %v416_v30  ;;  %v107_v49 = vrot.slane %v99_v41, %v418_v31  ;;  %vm460_vm12 = vcmp.eq.s32.totalorder %v77_v40, 1  ;;  %v131_v53 = vrot.slane %v127_v42, %v416_v30 }
   0xb   :  { %24 = vrot.lane.b32.xlu1 %v365_v5, %s320_s21  ;;  %26 = vrot.lane.b32.xlu0 %v370_v6, %s320_s21  ;;  %vm441_vm7 = vcmp.eq.s32.totalorder %v47_v36, 1  ;;  %vm445_vm8 = vcmp.eq.s32.totalorder %v51_v37, 1  ;;  %vm118_vm13 = vcmp.lt.s32.totalorder %v423_v34, 1  ;;  %v135_v54 = vrot.slane %v127_v42, %v418_v31 }
   0xc   :  { %310 = vset.pattern.permute.xlu1 %v321_v7  ;;  %311 = vset.pattern.permute.xlu0 %v322_v8  ;;  %v167_v56 = vrot.slane %v163_v46, %v416_v30  ;;  %v171_v57 = vrot.slane %v163_v46, %v418_v31  ;;  %vm481_vm15 = vcmp.eq.s32.totalorder %v103_v48, 1  ;;  %vm485_vm0 = vcmp.eq.s32.totalorder %v107_v49, 1 }
   0xd   :  { %vm489_vm1 = vcmp.eq.s32.totalorder %v131_v53, 1  ;;  %vm504_vm2 = vcmp.eq.s32.totalorder %v135_v54, 1  ;;  %vm154_vm4 = vcmp.lt.s32.totalorder %v423_v34, 127  ;;  %v221_v32 = vsel %vm191_vm9, 1, %v317_v1 }
   0xe   :  { %v225_v46 = vrot.slane %v221_v32, %v416_v30 }
   0xf   :  { %56 = vrot.lane.b32.xlu1 %v365_v5, %s323_s1  ;;  %58 = vrot.lane.b32.xlu0 %v370_v6, %s323_s1 }
  0x13   :  { %143 = vperm.xlu1 %310, %v19_v2   ;;  %84 = vrot.lane.b32.xlu0 %v365_v5, %s324_s22 }
  0x17   :  { %86 = vrot.lane.b32.xlu1 %v370_v6, %s324_s22  ;;  %158 = vperm.xlu0 %311, %v19_v2  }
  0x18   :  { %313 = vset.pattern.permute.xlu1 %v325_v9  ;;  %v193_v9 = vsel %vm192_vm14, 1, %v317_v1 }
  0x19   :  { %v197_v27 = vrot.slane %v193_v9, %v416_v30 }
  0x1b   :  { %114 = vrot.lane.b32.xlu1 %v365_v5, %s326_s0  ;;  %312 = vset.pattern.permute.xlu0 %v327_v10 }
  0x1c   :  { %186 = vperm.xlu0 %312, %v19_v2  }
  0x1f   :  { %116 = vrot.lane.b32.xlu1 %v370_v6, %s326_s0 }
  0x20   :  { %152 = vrot.lane.b32.xlu0 %v370_v6, %s328_s23 }
  0x21   :  { %315 = vset.pattern.permute.xlu0 %v317_v1 }
  0x23   :  { %216 = vperm.xlu1 %313, %v19_v2  }
  0x24   :  { %178 = vrot.lane.b32.xlu0 %v365_v5, %s329_s24 }
  0x27   :  { %150 = vrot.lane.b32.xlu1 %v365_v5, %s328_s23 }
  0x28   :  { %314 = vset.pattern.permute.xlu1 %v330_v11  ;;  %208 = vrot.lane.b32.xlu0 %v365_v5, %s331_s25 }
  0x2b   :  { %244 = vperm.xlu1 %314, %v19_v2  }
  0x2c   :  { %267 = vperm.xlu0 %315, %v20_v12  }
  0x2f   :  { %180 = vrot.lane.b32.xlu1 %v370_v6, %s329_s24 }
  0x33   :  { %210 = vrot.lane.b32.xlu1 %v370_v6, %s331_s25 }
  0x37   :  { %236 = vrot.lane.b32.xlu1 %v365_v5, %s332_s28 }
  0x3b   :  { %238 = vrot.lane.b32.xlu1 %v370_v6, %s332_s28 }
  0x81   :  { %v392_v13 = vpop.permute.xlu1 %92  ;;  %v394_v14 = vpop.permute.xlu0 %35 }
  0x86   :  { %v396_v15 = vpop.permute.xlu1 %122  ;;  %v65_v16 = vpop.permute.xlu0 %64 }
  0x8a   :  { %v25_v17 = vpop.permute.xlu1 %24  ;;  %v27_v18 = vpop.permute.xlu0 %26 }
  0x8b   :  { %v31_v59 = vsel %vm30_vm5, %v25_v17, %v27_v18  ;;  %v32_v60 = vsel %vm30_vm5, %v27_v18, %v25_v17  ;;  %vm509_vm5 = vcmp.eq.s32.totalorder %v167_v56, 1 }
  0x8c   :  { %v38_v10 = vmul.f32 %v394_v14, %v32_v60  ;;  %v39_v11 = vmul.f32 %v394_v14, %v31_v59 }
  0x8e   :  { %v57_v19 = vpop.permute.xlu1 %56  ;;  %v59_v20 = vpop.permute.xlu0 %58  ;;  %v54_v33 = vsel %vm441_vm7, %v38_v10, 0.0  ;;  %vm249_vm7 = vmand %vm191_vm9, %vm97_vm3  ;;  %vm559_vm3 = vcmp.eq.s32.totalorder %v197_v27, 1 }
  0x8f   :  { %v61_v51 = vsel %vm60_vm6, %v57_v19, %v59_v20  ;;  %v62_v52 = vsel %vm60_vm6, %v59_v20, %v57_v19  ;;  %vm513_vm6 = vcmp.eq.s32.totalorder %v171_v57, 1  ;;  %v250_v54 = vsel %vm249_vm7, 1, %v317_v1 }
  0x90   :  { %v67_v63 = vmul.f32 %v65_v16, %v62_v52  ;;  %v68_v0 = vmul.f32 %v65_v16, %v61_v51  ;;  %v229_v52 = vrot.slane %v221_v32, %v418_v31 }
  0x92   :  { %v398_v21 = vpop.permute.xlu1 %143  ;;  %v85_v25 = vpop.permute.xlu0 %84  ;;  %v80_v14 = vsel %vm453_vm10, %v67_v63, 0.0  ;;  %v254_v63 = vrot.slane %v250_v54, %v416_v30  ;;  %vm581_vm10 = vcmp.eq.s32.totalorder %v225_v46, 1 }
  0x93   :  { %v82_v38 = vadd.f32 %v80_v14, %v54_v33  ;;  %v147_v1 = vmul.f32 %v398_v21, %v370_v6 }
  0x94   :  { %vm259_vm14 = vcmp.eq.s32.totalorder %v254_v63, 1 }
  0x96   :  { %v87_v26 = vpop.permute.xlu1 %86  ;;  %v414_v29 = vpop.permute.xlu0 %158 }
  0x97   :  { %v89_v61 = vsel %vm88_vm11, %v85_v25, %v87_v26  ;;  %v90_v62 = vsel %vm88_vm11, %v87_v26, %v85_v25  ;;  %vm182_vm11 = vcmp.lt.s32.totalorder %v423_v34, 113 }
  0x98   :  { %v95_v12 = vmul.f32 %v392_v13, %v90_v62  ;;  %v96_v16 = vmul.f32 %v392_v13, %v89_v61  ;;  %v81_v13 = vsel %vm460_vm12, %v68_v0, 0.0  ;;  %v146_v62 = vmul.f32 %v398_v21, %v365_v5 }
  0x99   :  { %v258_v0 = vrot.slane %v250_v54, %v418_v31  ;;  %vm585_vm12 = vcmp.eq.s32.totalorder %v229_v52, 1 }
  0x9a   :  { %v115_v28 = vpop.permute.xlu1 %114  ;;  %v111_v36 = vsel %vm485_vm0, %v96_v16, 0.0  ;;  %vm275_vm0 = vcmask 7168  }
  0x9b   :  { %v430_v39 = vpop.permute.xlu0 %186 }
  0x9e   :  { %v117_v35 = vpop.permute.xlu1 %116 }
  0x9f   :  { %v153_v55 = vpop.permute.xlu0 %152  ;;  %v119_v7 = vsel %vm118_vm13, %v115_v28, %v117_v35  ;;  %v120_v8 = vsel %vm118_vm13, %v117_v35, %v115_v28  ;;  %v201_v28 = vrot.slane %v193_v9, %v418_v31  ;;  %v55_v35 = vsel %vm445_vm8, %v39_v11, 0.0 }
  0xa0   :  { %v125_v24 = vmul.f32 %v396_v15, %v120_v8  ;;  %v126_v25 = vmul.f32 %v396_v15, %v119_v7  ;;  %v110_v15 = vsel %vm481_vm15, %v95_v12, 0.0  ;;  %v83_v40 = vadd.f32 %v81_v13, %v55_v35 }
  0xa1   :  { %vm212_vm8 = vcmp.lt.s32.totalorder %v423_v34, 112  ;;  %v112_v47 = vadd.f32 %v110_v15, %v82_v38  ;;  %vm563_vm9 = vcmp.eq.s32.totalorder %v201_v28, 1  ;;  %vm240_vm13 = vcmp.lt.s32.totalorder %v423_v34, 111 }
  0xa2   :  { %v439_v43 = vpop.permute.xlu1 %216  ;;  %v138_v44 = vsel %vm489_vm1, %v125_v24, 0.0  ;;  %v139_v45 = vsel %vm504_vm2, %v126_v25, 0.0  ;;  %v113_v48 = vadd.f32 %v111_v36, %v83_v40  ;;  %vm260_vm15 = vcmp.eq.s32.totalorder %v258_v0, 1 }
  0xa3   :  { %v179_v26 = vpop.permute.xlu0 %178  ;;  %vm282_vm1 = vcmask 15368  }
  0xa4   :  { %v141_v56 = vadd.f32 %v139_v45, %v113_v48 }
  0xa6   :  { %v151_v58 = vpop.permute.xlu1 %150  ;;  %v149_v5 = vadd.f32 %v147_v1, %v141_v56 }
  0xa7   :  { %v155_v41 = vsel %vm154_vm4, %v151_v58, %v153_v55  ;;  %v156_v42 = vsel %vm154_vm4, %v153_v55, %v151_v58  ;;  %v209_v51 = vpop.permute.xlu0 %208  ;;  %v140_v55 = vadd.f32 %v138_v44, %v112_v47 }
  0xa8   :  { %v161_v22 = vmul.f32 %v414_v29, %v155_v41  ;;  %v162_v50 = vmul.f32 %v414_v29, %v156_v42 }
  0xa9   :  { %v148_v8 = vadd.f32 %v146_v62, %v140_v55 }
  0xaa   :  { %v502_v17 = vpop.permute.xlu1 %244  ;;  %v174_v2 = vsel %vm509_vm5, %v161_v22, 0.0  ;;  %v175_v3 = vsel %vm513_vm6, %v162_v50, 0.0 }
  0xab   :  { %v176_v31 = vadd.f32 %v174_v2, %v148_v8  ;;  %v268_v25 = vpop.permute.xlu0 %267 }
  0xae   :  { %v181_v37 = vpop.permute.xlu1 %180 }
  0xaf   :  { %v183_v49 = vsel %vm182_vm11, %v179_v26, %v181_v37  ;;  %v184_v23 = vsel %vm182_vm11, %v181_v37, %v179_v26 }
  0xb0   :  { %v189_v29 = vmul.f32 %v430_v39, %v183_v49  ;;  %v190_v61 = vmul.f32 %v430_v39, %v184_v23 }
  0xb2   :  { %v211_v53 = vpop.permute.xlu1 %210  ;;  %v204_v21 = vsel %vm559_vm3, %v189_v29, 0.0  ;;  %v205_v30 = vsel %vm563_vm9, %v190_v61, 0.0 }
  0xb3   :  { %v213_v57 = vsel %vm212_vm8, %v209_v51, %v211_v53  ;;  %v214_v58 = vsel %vm212_vm8, %v211_v53, %v209_v51  ;;  %v206_v16 = vadd.f32 %v204_v21, %v176_v31 }
  0xb4   :  { %v219_v4 = vmul.f32 %v439_v43, %v213_v57  ;;  %v220_v39 = vmul.f32 %v439_v43, %v214_v58  ;;  %v177_v43 = vadd.f32 %v175_v3, %v149_v5 }
  0xb6   :  { %v237_v7 = vpop.permute.xlu1 %236  ;;  %v232_v10 = vsel %vm581_vm10, %v219_v4, 0.0  ;;  %v233_v11 = vsel %vm585_vm12, %v220_v39, 0.0  ;;  %v207_v18 = vadd.f32 %v205_v30, %v177_v43 }
  0xb7   :  { %v234_v34 = vadd.f32 %v232_v10, %v206_v16 }
  0xb8   :  { %v235_v24 = vadd.f32 %v233_v11, %v207_v18 }
  0xba   :  { %v239_v12 = vpop.permute.xlu1 %238 }
  0xbb   :  { %v241_v19 = vsel %vm240_vm13, %v237_v7, %v239_v12  ;;  %v242_v20 = vsel %vm240_vm13, %v239_v12, %v237_v7 }
  0xbc   :  { %v247_v14 = vmul.f32 %v502_v17, %v241_v19  ;;  %v248_v13 = vmul.f32 %v502_v17, %v242_v20 }
  0xbe   :  { %v261_v26 = vsel %vm259_vm14, %v247_v14, 0.0  ;;  %v262_v27 = vsel %vm260_vm15, %v248_v13, 0.0 }
  0xbf   :  { %v263_v28 = vadd.f32 %v261_v26, %v234_v34  ;;  %v264_v32 = vadd.f32 %v262_v27, %v235_v24 }
  0xc1   :  { %v270_v33 = vadd.f32 %v268_v25, %v263_v28  ;;  %v271_v35 = vadd.f32 %v268_v25, %v264_v32 }
  0xc3   :  { %v272_v15 = vadd.f32 %v271_v35, %v270_v33  ;;  %v277_v36 = vmul.f32 %v270_v33, %v270_v33  ;;  %v278_v37 = vmul.f32 %v271_v35, %v271_v35 }
  0xc5   :  { %273 = vadd.xlane.f32.xlu0 %v272_v15  ;;  %v279_v38 = vadd.f32 %v278_v37, %v277_v36 }
  0xc7   :  { %280 = vadd.xlane.f32.xlu1 %v279_v38 }
 0x152   :  { %v274_v40 = vpop.xlane.xlu0 %273 }
 0x153   :  { %276 = vst.msk [vmem:[%s610_s4] sm:$0xff] %vm275_vm0, %v274_v40 }
 0x154   :  { %v281_v17 = vpop.xlane.xlu1 %280 }
 0x155   :  { %283 = vst.msk [vmem:[%s610_s4] sm:$0xff] %vm282_vm1, %v281_v17 }

// kernel: frelu_forward.3
= control target key start
LH: loop header
LB: loop body
LE: loop exit
PB: predicated region body
PF: predicated region fallthrough
CT: control target
= control target key end

     0   :  { %v331_v0 = vmov 2   ;;  %v332_v1 = vmov 0   ;;  %v333_v3 = vmov 3   ;;  %v334_v4 = vmov 1   ;;  %s335_s27 = smov 17   ;;  %s339_s28 = smov 15   ;;  %s640_s1 = inlined_call_operand.vmem [shape: f32[8,9], index: 1, kind: input, shape index: {}]   ;;  %s641_s0 = inlined_call_operand.vmem [shape: f32[1,8,256], index: 0, kind: input, shape index: {}]   ;;  %s642_s2 = inlined_call_operand.vmem [shape: f32[8,1], index: 2, kind: input, shape index: {}]   ;;  %s643_s4 = inlined_call_operand.vmem [shape: f32[8,1], index: 4, kind: input, shape index: {}]   ;;  %s644_s5 = inlined_call_operand.vmem [shape: f32[8,1], index: 5, kind: input, shape index: {}]   ;;  %s645_s3 = inlined_call_operand.vmem [shape: s32[2,256], index: 3, kind: input, shape index: {}]   ;;  %s646_s6 = inlined_call_operand.vmem [shape: f32[1,8,256], index: 6, kind: output, shape index: {}]  }
   0x1   :  { %322 = vset.pattern.permute.xlu1 %v331_v0  ;;  %320 = vset.pattern.permute.xlu0 %v332_v1  ;;  %v25_v2 = vld [vmem:[%s640_s1] sm:$0xff]  ;;  %v395_v6 = vld [vmem:[%s641_s0 + $0x8] sm:$0xff]  ;;  %v336_v7 = vmov 4   ;;  %v337_v8 = vmov 5   ;;  %s338_s1 = smov 16   ;;  %v340_v9 = vmov 7   ;;  %v34_v26 = vlaneseq }
   0x2   :  { %98 = vperm.xlu1 %322, %v25_v2   ;;  %41 = vperm.xlu0 %320, %v25_v2   ;;  %v390_v5 = vld [vmem:[%s641_s0] sm:$0xff]  ;;  %s341_s0 = smov 1   ;;  %v342_v10 = vmov 6   ;;  %s343_s29 = smov 127   ;;  %v345_v11 = vmov 8  }
   0x3   :  { %s344_s30 = smov 113   ;;  %s346_s7 = smov 112   ;;  %v26_v12 = vld [vmem:[%s642_s2] sm:$0xff]  ;;  %v51_v29 = vshrl.u32 %v34_v26, 7  ;;  %v455_v36 = vand.u32 127, %v34_v26 }
   0x4   :  { %v278_v13 = vld [vmem:[%s643_s4] sm:$0xff]  ;;  %s347_s12 = smov 111  }
   0x5   :  { %v286_v14 = vld [vmem:[%s644_s5] sm:$0xff]  ;;  %v448_v32 = vsub.s32 0, %v51_v29  ;;  %v450_v33 = vsub.s32 1, %v51_v29  ;;  %vm36_vm5 = vcmp.lt.s32.totalorder %v455_v36, 17  ;;  %vm66_vm6 = vcmp.lt.s32.totalorder %v455_v36, 16 }
   0x6   :  { %323 = vset.pattern.permute.xlu1 %v333_v3  ;;  %321 = vset.pattern.permute.xlu0 %v334_v4  ;;  %v435_v24 = vld [vmem:[%s645_s3] ss:$2 sm:$0x3]  ;;  %v440_v25 = vld [vmem:[%s645_s3 + $0x1] ss:$2 sm:$0x3] }
   0x7   :  { %128 = vperm.xlu1 %323, %v25_v2   ;;  %70 = vperm.xlu0 %321, %v25_v2   ;;  %vm46_vm0 = vcmp.ge.s32.totalorder %v435_v24, 1  ;;  %vm47_vm1 = vcmp.ge.s32.totalorder %v440_v25, 1  ;;  %vm103_vm3 = vcmp.le.s32.totalorder %v440_v25, 14  ;;  %vm197_vm9 = vcmp.le.s32.totalorder %v435_v24, 14 }
   0x8   :  { %vm48_vm2 = vmand %vm46_vm0, %vm47_vm1  ;;  %v75_v35 = vsel %vm46_vm0, 1, %v332_v1  ;;  %v133_v44 = vsel %vm47_vm1, 1, %v332_v1  ;;  %v169_v48 = vsel %vm103_vm3, 1, %v332_v1  ;;  %vm94_vm11 = vcmp.lt.s32.totalorder %v455_v36, 15 }
   0x9   :  { %v49_v34 = vsel %vm48_vm2, 1, %v332_v1  ;;  %vm104_vm4 = vmand %vm46_vm0, %vm103_vm3  ;;  %v79_v40 = vrot.slane %v75_v35, %v448_v32  ;;  %v83_v42 = vrot.slane %v75_v35, %v450_v33  ;;  %v137_v55 = vrot.slane %v133_v44, %v448_v32 }
   0xa   :  { %v53_v38 = vrot.slane %v49_v34, %v448_v32  ;;  %v57_v39 = vrot.slane %v49_v34, %v450_v33  ;;  %v105_v43 = vsel %vm104_vm4, 1, %v332_v1  ;;  %vm124_vm13 = vcmp.lt.s32.totalorder %v455_v36, 1  ;;  %vm198_vm14 = vmand %vm197_vm9, %vm47_vm1 }
   0xb   :  { %30 = vrot.lane.b32.xlu1 %v390_v5, %s335_s27  ;;  %32 = vrot.lane.b32.xlu0 %v395_v6, %s335_s27  ;;  %vm485_vm10 = vcmp.eq.s32.totalorder %v79_v40, 1  ;;  %v109_v50 = vrot.slane %v105_v43, %v448_v32  ;;  %v113_v51 = vrot.slane %v105_v43, %v450_v33  ;;  %vm492_vm12 = vcmp.eq.s32.totalorder %v83_v42, 1 }
   0xc   :  { %324 = vset.pattern.permute.xlu1 %v336_v7  ;;  %325 = vset.pattern.permute.xlu0 %v337_v8  ;;  %vm473_vm7 = vcmp.eq.s32.totalorder %v53_v38, 1  ;;  %vm477_vm8 = vcmp.eq.s32.totalorder %v57_v39, 1  ;;  %v141_v56 = vrot.slane %v133_v44, %v450_v33  ;;  %v173_v58 = vrot.slane %v169_v48, %v448_v32 }
   0xd   :  { %v177_v59 = vrot.slane %v169_v48, %v450_v33  ;;  %vm513_vm15 = vcmp.eq.s32.totalorder %v109_v50, 1  ;;  %vm517_vm0 = vcmp.eq.s32.totalorder %v113_v51, 1  ;;  %vm521_vm1 = vcmp.eq.s32.totalorder %v137_v55, 1 }
   0xe   :  { %vm536_vm2 = vcmp.eq.s32.totalorder %v141_v56, 1  ;;  %vm160_vm4 = vcmp.lt.s32.totalorder %v455_v36, 127  ;;  %v227_v34 = vsel %vm197_vm9, 1, %v332_v1 }
   0xf   :  { %62 = vrot.lane.b32.xlu1 %v390_v5, %s338_s1  ;;  %64 = vrot.lane.b32.xlu0 %v395_v6, %s338_s1  ;;  %v231_v48 = vrot.slane %v227_v34, %v448_v32 }
  0x13   :  { %149 = vperm.xlu1 %324, %v25_v2   ;;  %90 = vrot.lane.b32.xlu0 %v390_v5, %s339_s28 }
  0x17   :  { %92 = vrot.lane.b32.xlu1 %v395_v6, %s339_s28  ;;  %164 = vperm.xlu0 %325, %v25_v2  }
  0x18   :  { %327 = vset.pattern.permute.xlu1 %v340_v9 }
  0x1b   :  { %120 = vrot.lane.b32.xlu1 %v390_v5, %s341_s0  ;;  %326 = vset.pattern.permute.xlu0 %v342_v10 }
  0x1c   :  { %192 = vperm.xlu0 %326, %v25_v2  }
  0x1f   :  { %122 = vrot.lane.b32.xlu1 %v395_v6, %s341_s0 }
  0x20   :  { %158 = vrot.lane.b32.xlu0 %v395_v6, %s343_s29 }
  0x21   :  { %329 = vset.pattern.permute.xlu0 %v332_v1 }
  0x23   :  { %222 = vperm.xlu1 %327, %v25_v2  }
  0x24   :  { %184 = vrot.lane.b32.xlu0 %v390_v5, %s344_s30 }
  0x27   :  { %156 = vrot.lane.b32.xlu1 %v390_v5, %s343_s29 }
  0x28   :  { %328 = vset.pattern.permute.xlu1 %v345_v11  ;;  %214 = vrot.lane.b32.xlu0 %v390_v5, %s346_s7  ;;  %v199_v11 = vsel %vm198_vm14, 1, %v332_v1 }
  0x29   :  { %v203_v29 = vrot.slane %v199_v11, %v448_v32 }
  0x2b   :  { %250 = vperm.xlu1 %328, %v25_v2  }
  0x2c   :  { %273 = vperm.xlu0 %329, %v26_v12  }
  0x2f   :  { %186 = vrot.lane.b32.xlu1 %v395_v6, %s344_s30 }
  0x30   :  { %281 = vperm.xlu0 %329, %v278_v13   ;;  %330 = vset.pattern.permute.xlu1 %v332_v1 }
  0x33   :  { %216 = vrot.lane.b32.xlu1 %v395_v6, %s346_s7 }
  0x37   :  { %242 = vrot.lane.b32.xlu1 %v390_v5, %s347_s12 }
  0x3b   :  { %244 = vrot.lane.b32.xlu1 %v395_v6, %s347_s12 }
  0x3f   :  { %289 = vperm.xlu1 %330, %v286_v14  }
  0x81   :  { %v424_v15 = vpop.permute.xlu1 %98  ;;  %v426_v16 = vpop.permute.xlu0 %41 }
  0x86   :  { %v428_v17 = vpop.permute.xlu1 %128  ;;  %v71_v18 = vpop.permute.xlu0 %70 }
  0x8a   :  { %v31_v19 = vpop.permute.xlu1 %30  ;;  %v33_v20 = vpop.permute.xlu0 %32 }
  0x8b   :  { %v37_v61 = vsel %vm36_vm5, %v31_v19, %v33_v20  ;;  %v38_v62 = vsel %vm36_vm5, %v33_v20, %v31_v19  ;;  %vm541_vm5 = vcmp.eq.s32.totalorder %v173_v58, 1 }
  0x8c   :  { %v44_v12 = vmul.f32 %v426_v16, %v38_v62  ;;  %v45_v13 = vmul.f32 %v426_v16, %v37_v61 }
  0x8e   :  { %v63_v21 = vpop.permute.xlu1 %62  ;;  %v65_v22 = vpop.permute.xlu0 %64  ;;  %v60_v35 = vsel %vm473_vm7, %v44_v12, 0.0  ;;  %vm255_vm7 = vmand %vm197_vm9, %vm103_vm3  ;;  %vm591_vm3 = vcmp.eq.s32.totalorder %v203_v29, 1 }
  0x8f   :  { %v67_v53 = vsel %vm66_vm6, %v63_v21, %v65_v22  ;;  %v68_v54 = vsel %vm66_vm6, %v65_v22, %v63_v21  ;;  %vm545_vm6 = vcmp.eq.s32.totalorder %v177_v59, 1  ;;  %v256_v56 = vsel %vm255_vm7, 1, %v332_v1 }
  0x90   :  { %v73_v2 = vmul.f32 %v71_v18, %v68_v54  ;;  %v74_v3 = vmul.f32 %v71_v18, %v67_v53  ;;  %v235_v54 = vrot.slane %v227_v34, %v450_v33 }
  0x92   :  { %v430_v23 = vpop.permute.xlu1 %149  ;;  %v91_v27 = vpop.permute.xlu0 %90  ;;  %v86_v16 = vsel %vm485_vm10, %v73_v2, 0.0  ;;  %v260_v2 = vrot.slane %v256_v56, %v448_v32  ;;  %vm613_vm10 = vcmp.eq.s32.totalorder %v231_v48, 1 }
  0x93   :  { %v88_v40 = vadd.f32 %v86_v16, %v60_v35  ;;  %v153_v1 = vmul.f32 %v430_v23, %v395_v6 }
  0x94   :  { %vm265_vm14 = vcmp.eq.s32.totalorder %v260_v2, 1 }
  0x96   :  { %v93_v28 = vpop.permute.xlu1 %92  ;;  %v446_v31 = vpop.permute.xlu0 %164 }
  0x97   :  { %v95_v63 = vsel %vm94_vm11, %v91_v27, %v93_v28  ;;  %v96_v0 = vsel %vm94_vm11, %v93_v28, %v91_v27  ;;  %vm188_vm11 = vcmp.lt.s32.totalorder %v455_v36, 113 }
  0x98   :  { %v101_v14 = vmul.f32 %v424_v15, %v96_v0  ;;  %v102_v18 = vmul.f32 %v424_v15, %v95_v63  ;;  %v87_v15 = vsel %vm492_vm12, %v74_v3, 0.0  ;;  %v152_v0 = vmul.f32 %v430_v23, %v390_v5 }
  0x99   :  { %v264_v3 = vrot.slane %v256_v56, %v450_v33  ;;  %vm617_vm12 = vcmp.eq.s32.totalorder %v235_v54, 1 }
  0x9a   :  { %v121_v30 = vpop.permute.xlu1 %120  ;;  %v117_v38 = vsel %vm517_vm0, %v102_v18, 0.0 }
  0x9b   :  { %v462_v41 = vpop.permute.xlu0 %192 }
  0x9e   :  { %v123_v37 = vpop.permute.xlu1 %122 }
  0x9f   :  { %v159_v57 = vpop.permute.xlu0 %158  ;;  %v125_v9 = vsel %vm124_vm13, %v121_v30, %v123_v37  ;;  %v126_v10 = vsel %vm124_vm13, %v123_v37, %v121_v30  ;;  %v207_v30 = vrot.slane %v199_v11, %v450_v33  ;;  %v61_v37 = vsel %vm477_vm8, %v45_v13, 0.0 }
  0xa0   :  { %v131_v26 = vmul.f32 %v428_v17, %v126_v10  ;;  %v132_v27 = vmul.f32 %v428_v17, %v125_v9  ;;  %v116_v17 = vsel %vm513_vm15, %v101_v14, 0.0  ;;  %v89_v42 = vadd.f32 %v87_v15, %v61_v37 }
  0xa1   :  { %vm218_vm8 = vcmp.lt.s32.totalorder %v455_v36, 112  ;;  %v118_v49 = vadd.f32 %v116_v17, %v88_v40  ;;  %vm595_vm9 = vcmp.eq.s32.totalorder %v207_v30, 1  ;;  %vm246_vm13 = vcmp.lt.s32.totalorder %v455_v36, 111 }
  0xa2   :  { %v471_v45 = vpop.permute.xlu1 %222  ;;  %v144_v46 = vsel %vm521_vm1, %v131_v26, 0.0  ;;  %v145_v47 = vsel %vm536_vm2, %v132_v27, 0.0  ;;  %v119_v50 = vadd.f32 %v117_v38, %v89_v42  ;;  %vm266_vm15 = vcmp.eq.s32.totalorder %v264_v3, 1 }
  0xa3   :  { %v185_v28 = vpop.permute.xlu0 %184 }
  0xa4   :  { %v147_v58 = vadd.f32 %v145_v47, %v119_v50 }
  0xa6   :  { %v157_v60 = vpop.permute.xlu1 %156  ;;  %v155_v11 = vadd.f32 %v153_v1, %v147_v58 }
  0xa7   :  { %v161_v43 = vsel %vm160_vm4, %v157_v60, %v159_v57  ;;  %v162_v44 = vsel %vm160_vm4, %v159_v57, %v157_v60  ;;  %v215_v53 = vpop.permute.xlu0 %214  ;;  %v146_v57 = vadd.f32 %v144_v46, %v118_v49 }
  0xa8   :  { %v167_v24 = vmul.f32 %v446_v31, %v161_v43  ;;  %v168_v52 = vmul.f32 %v446_v31, %v162_v44 }
  0xa9   :  { %v154_v10 = vadd.f32 %v152_v0, %v146_v57 }
  0xaa   :  { %v534_v19 = vpop.permute.xlu1 %250  ;;  %v180_v4 = vsel %vm541_vm5, %v167_v24, 0.0  ;;  %v181_v7 = vsel %vm545_vm6, %v168_v52, 0.0 }
  0xab   :  { %v183_v13 = vadd.f32 %v181_v7, %v155_v11  ;;  %v274_v26 = vpop.permute.xlu0 %273 }
  0xae   :  { %v187_v39 = vpop.permute.xlu1 %186 }
  0xaf   :  { %v189_v51 = vsel %vm188_vm11, %v185_v28, %v187_v39  ;;  %v190_v25 = vsel %vm188_vm11, %v187_v39, %v185_v28  ;;  %v282_v39 = vpop.permute.xlu0 %281 }
  0xb0   :  { %v195_v31 = vmul.f32 %v462_v41, %v189_v51  ;;  %v196_v63 = vmul.f32 %v462_v41, %v190_v25 }
  0xb2   :  { %v217_v55 = vpop.permute.xlu1 %216  ;;  %v210_v32 = vsel %vm591_vm3, %v195_v31, 0.0  ;;  %v211_v33 = vsel %vm595_vm9, %v196_v63, 0.0 }
  0xb3   :  { %v219_v59 = vsel %vm218_vm8, %v215_v53, %v217_v55  ;;  %v220_v60 = vsel %vm218_vm8, %v217_v55, %v215_v53  ;;  %v213_v22 = vadd.f32 %v211_v33, %v183_v13 }
  0xb4   :  { %v225_v8 = vmul.f32 %v471_v45, %v219_v59  ;;  %v226_v41 = vmul.f32 %v471_v45, %v220_v60  ;;  %v182_v45 = vadd.f32 %v180_v4, %v154_v10 }
  0xb6   :  { %v243_v9 = vpop.permute.xlu1 %242  ;;  %v238_v14 = vsel %vm613_vm10, %v225_v8, 0.0  ;;  %v239_v18 = vsel %vm617_vm12, %v226_v41, 0.0  ;;  %v212_v21 = vadd.f32 %v210_v32, %v182_v45 }
  0xb7   :  { %v241_v29 = vadd.f32 %v239_v18, %v213_v22 }
  0xb8   :  { %v240_v28 = vadd.f32 %v238_v14, %v212_v21 }
  0xba   :  { %v245_v20 = vpop.permute.xlu1 %244 }
  0xbb   :  { %v247_v16 = vsel %vm246_vm13, %v243_v9, %v245_v20  ;;  %v248_v15 = vsel %vm246_vm13, %v245_v20, %v243_v9 }
  0xbc   :  { %v253_v27 = vmul.f32 %v534_v19, %v247_v16  ;;  %v254_v36 = vmul.f32 %v534_v19, %v248_v15 }
  0xbe   :  { %v267_v30 = vsel %vm265_vm14, %v253_v27, 0.0  ;;  %v268_v34 = vsel %vm266_vm15, %v254_v36, 0.0  ;;  %v290_v40 = vpop.permute.xlu1 %289 }
  0xbf   :  { %v269_v35 = vadd.f32 %v267_v30, %v240_v28  ;;  %v270_v37 = vadd.f32 %v268_v34, %v241_v29 }
  0xc1   :  { %v276_v17 = vadd.f32 %v274_v26, %v269_v35  ;;  %v277_v38 = vadd.f32 %v274_v26, %v270_v37 }
  0xc3   :  { %v284_v42 = vmul.f32 %v282_v39, %v276_v17  ;;  %v285_v43 = vmul.f32 %v282_v39, %v277_v38 }
  0xc5   :  { %v292_v44 = vadd.f32 %v290_v40, %v284_v42  ;;  %v293_v46 = vadd.f32 %v290_v40, %v285_v43 }
  0xc7   :  { %v294_v47 = vmax.f32 %v390_v5, %v292_v44  ;;  %v295_v48 = vmax.f32 %v395_v6, %v293_v46 }
  0xc9   :  { %296 = vst [vmem:[%s646_s6] sm:$0xff] %v294_v47  ;;  %297 = vst [vmem:[%s646_s6 + $0x8] sm:$0xff] %v295_v48 }

</bundles_post_ra>
